<compile_context>
chip_gen: v7x
topology: tpu7x:2x2x1
jax: 0.10.0
libtpu: 0.0.40
codegen_flags: <defaults>
</compile_context>

<pallas_src>
import functools

import jax
import jax.numpy as jnp
import numpy as np
from jax.experimental import pallas as pl
from jax.experimental.pallas import tpu as pltpu


def _round_up(x, m):
    return ((x + m - 1) // m) * m


def _choose_tp(P, tp_pref=512):
    """Patch-tile rows: 16-aligned (bf16 sublane packing), a divisor of P when
    possible so there is no ragged last block, no padding, no de-pad slice."""
    if P <= tp_pref:
        return P                      # single tile along P (full-dim block)
    for tp in range(tp_pref - tp_pref % 16, 15, -16):
        if P % tp == 0:
            return tp
    return tp_pref - tp_pref % 16     # ragged last block; Pallas clips stores


def _resident_spec(block_shape, index_map):
    """Single pipeline buffer for blocks whose index_map is constant over the
    inner (batch) grid axis: weight / positional tiles. Saves VMEM (v7x)."""
    try:
        return pl.BlockSpec(block_shape, index_map,
                            pipeline_mode=pl.Buffered(buffer_count=1))
    except (TypeError, AttributeError, ValueError):
        # Older jax without per-operand pipeline_mode: fall back to default.
        return pl.BlockSpec(block_shape, index_map)


def _vmem_limit_bytes(per_step_bytes):
    """Generation-aware scoped-VMEM budget (~48 MiB on v7x, ~96 MiB v5e/v6e)."""
    try:
        cap = int(pltpu.get_tpu_info().vmem_capacity_bytes)
    except Exception:
        cap = 64 * 1024 * 1024        # conservative fallback (v7x per-core)
    budget = int(0.75 * cap)
    return int(min(budget, max(per_step_bytes + (4 << 20), 32 << 20)))


# ----------------------------- Pallas kernel ------------------------------ #
def _vivit_embed_kernel(patches_ref, w_ref, pos_ref, o_ref):
    # patches_ref: (tp, Kp) bf16 | w_ref: (Kp, H) bf16
    # pos_ref:     (tp, H)  f32  | o_ref: (tp, H)  out_dtype
    acc = jnp.dot(patches_ref[...], w_ref[...],
                  preferred_element_type=jnp.float32)       # MXU, f32 accum
    o_ref[...] = (acc + pos_ref[...]).astype(o_ref.dtype)


def vivit_embeddings_pallas(patches, w_flat, pos_plus_bias, *, tp_pref=512,
                            out_dtype=jnp.float32):
    """patches: (B, P, Kp) bf16, w_flat: (Kp, H) bf16, pos_plus_bias: (P, H) f32."""
    B, P, Kp = patches.shape
    H = w_flat.shape[1]

    tp = _choose_tp(P, tp_pref)
    n_p = pl.cdiv(P, tp)

    in_sz = jnp.dtype(patches.dtype).itemsize
    out_sz = jnp.dtype(out_dtype).itemsize
    # Conservative working-set estimate (all streams double-buffered).
    per_step = 2 * (tp * Kp * in_sz + Kp * H * in_sz
                    + tp * H * 4 + tp * H * out_sz)

    return pl.pallas_call(
        _vivit_embed_kernel,
        out_shape=jax.ShapeDtypeStruct((B, P, H), out_dtype),
        # Batch innermost: the weight (constant index_map) and the pos tile
        # (outer-index only) stay resident across the batch loop; each patch /
        # output tile is still DMA'd exactly once. Both axes "parallel" so the
        # v7x megacore can shard them.
        grid=(n_p, B),
        in_specs=[
            pl.BlockSpec((None, tp, Kp), lambda i, b: (b, i, 0)),
            _resident_spec((Kp, H), lambda i, b: (0, 0)),
            _resident_spec((tp, H), lambda i, b: (i, 0)),
        ],
        out_specs=pl.BlockSpec((None, tp, H), lambda i, b: (b, i, 0)),
        compiler_params=pltpu.CompilerParams(
            dimension_semantics=("parallel", "parallel"),
            vmem_limit_bytes=_vmem_limit_bytes(per_step),
        ),
    )(patches, w_flat, pos_plus_bias)


# ------------------------------ host glue --------------------------------- #
def extract_tubelet_patches(pixel_values, tubelet_size):
    """(B, T, C, H, W) -> (B, P, K); patch order (t', h', w') matches
    Conv3d(...).flatten(2).transpose(1, 2); K flattened as (c, kt, kh, kw) to
    match the Conv3d weight layout."""
    B, T, C, H, W = pixel_values.shape
    pt, ph, pw = tubelet_size
    Tn, Hn, Wn = T // pt, H // ph, W // pw
    x = jnp.transpose(pixel_values, (0, 2, 1, 3, 4))        # (B, C, T, H, W)
    x = x.reshape(B, C, Tn, pt, Hn, ph, Wn, pw)
    x = jnp.transpose(x, (0, 2, 4, 6, 1, 3, 5, 7))           # (B,Tn,Hn,Wn,C,pt,ph,pw)
    return x.reshape(B, Tn * Hn * Wn, C * pt * ph * pw)


@functools.partial(jax.jit,
                   static_argnames=("tubelet_size", "compute_dtype",
                                    "out_dtype", "tp_pref"))
def vivit_embeddings(pixel_values, conv_w, conv_b, pos_emb, *, tubelet_size,
                     compute_dtype=jnp.bfloat16, out_dtype=jnp.float32,
                     tp_pref=512):
    """Full VivitEmbeddings forward (eval mode): tubelet projection + pos add."""
    hidden = conv_w.shape[0]
    if pos_emb.ndim == 3:                                    # (1, P, H) -> (P, H)
        pos_emb = pos_emb[0]

    # Cast BEFORE the rearrange so the im2col HBM write is already bf16; the
    # whole pre-pass (cast + transpose + reshape) is fused under this jit.
    patches = extract_tubelet_patches(pixel_values.astype(compute_dtype),
                                      tubelet_size)          # (B, P, K) bf16
    w_flat = conv_w.reshape(hidden, -1).T.astype(compute_dtype)  # (K, hidden)

    # Pad K to a multiple of 128 only when needed; zero rows/cols are inert.
    K = patches.shape[-1]
    Kp = _round_up(K, 128)
    if Kp != K:
        patches = jnp.pad(patches, ((0, 0), (0, 0), (0, Kp - K)))
        w_flat = jnp.pad(w_flat, ((0, Kp - K), (0, 0)))

    # Fold the Conv3d bias into the positional embedding (one fewer stream).
    pos_plus_bias = (pos_emb.astype(jnp.float32)
                     + conv_b.astype(jnp.float32)[None, :])

    return vivit_embeddings_pallas(patches, w_flat, pos_plus_bias,
                                   tp_pref=tp_pref, out_dtype=out_dtype)


def reference_vivit_embeddings(pixel_values, conv_w, conv_b, pos_emb,
                               tubelet_size, cast_dtype=None):
    """Pure-JAX reference matching the PyTorch module (eval mode)."""
    if pos_emb.ndim == 3:
        pos_emb = pos_emb[0]
    patches = extract_tubelet_patches(pixel_values, tubelet_size)   # (B, P, K)
    w_flat = conv_w.reshape(conv_w.shape[0], -1).T                  # (K, H)
    if cast_dtype is not None:
        patches = patches.astype(cast_dtype)
        w_flat = w_flat.astype(cast_dtype)
    acc = jnp.einsum("bpk,kh->bph", patches, w_flat,
                     preferred_element_type=jnp.float32)
    return acc + conv_b[None, None, :] + pos_emb[None, :, :]


if __name__ == "__main__":
    # Small config consistent with the module.
    B = 2
    num_frames = 4
    num_channels = 3
    image_size = (16, 16)
    tubelet_size = (2, 4, 4)
    hidden_size = 32

    Tn = num_frames // tubelet_size[0]
    Hn = image_size[0] // tubelet_size[1]
    Wn = image_size[1] // tubelet_size[2]
    num_patches = Tn * Hn * Wn                                       # 32

    key = jax.random.PRNGKey(0)
    k_px, k_w, k_b, k_pos = jax.random.split(key, 4)

    pixel_values = jax.random.normal(
        k_px, (B, num_frames, num_channels, *image_size), dtype=jnp.float32
    )

    # Synthetic parameters (shapes per module __init__).
    conv_w = 0.02 * jax.random.normal(
        k_w, (hidden_size, num_channels, *tubelet_size), dtype=jnp.float32
    )                                                    # Conv3d weight
    conv_b = 0.01 * jax.random.normal(k_b, (hidden_size,), dtype=jnp.float32)
    position_embeddings = 0.02 * jax.random.normal(
        k_pos, (1, num_patches, hidden_size), dtype=jnp.float32
    )
    cls_token = jnp.zeros((1, 1, hidden_size), dtype=jnp.float32)  # unused in forward

    out = vivit_embeddings(
        pixel_values, conv_w, conv_b, position_embeddings,
        tubelet_size=tubelet_size,
        compute_dtype=jnp.bfloat16, out_dtype=jnp.float32,
    )
    out = jax.block_until_ready(out)
    assert out.shape == (B, num_patches, hidden_size)

    # (1) Exact-numerics check vs a reference using the same bf16 matmul inputs.
    ref_bf16 = reference_vivit_embeddings(
        pixel_values, conv_w, conv_b, position_embeddings, tubelet_size,
        cast_dtype=jnp.bfloat16,
    )
    np.testing.assert_allclose(np.asarray(out), np.asarray(ref_bf16),
                               rtol=1e-5, atol=1e-5)

    # (2) Fidelity check vs the full-f32 module reference (bf16 rounding only).
    ref_f32 = reference_vivit_embeddings(
        pixel_values, conv_w, conv_b, position_embeddings, tubelet_size
    )
    np.testing.assert_allclose(np.asarray(out), np.asarray(ref_f32),
                               rtol=2e-2, atol=2e-2)

    print("KERNEL_OK")
</pallas_src>

<mosaic_0001>
module attributes {stable_mosaic.version = 11 : i64} {
  func.func @_vivit_embed_kernel(%arg0: i32, %arg1: i32, %arg2: memref<1x32x128xbf16, #tpu.memory_space<vmem>>, %arg3: memref<128x32xbf16, #tpu.memory_space<vmem>>, %arg4: memref<32x32xf32, #tpu.memory_space<vmem>>, %arg5: memref<1x32x32xf32, #tpu.memory_space<vmem>>) attributes {dimension_semantics = [#tpu.dimension_semantics<parallel>, #tpu.dimension_semantics<parallel>], iteration_bounds = array<i64: 1, 2>, scalar_prefetch = 0 : i64, scratch_operands = 0 : i64, tpu.core_type = #tpu.core_type<tc>, window_params = [{transform_indices = @transform_0, window_bounds = array<i64: 1, 32, 128>}, {pipeline_mode = #tpu.pipeline_mode<synchronous>, transform_indices = @transform_1, window_bounds = array<i64: 128, 32>}, {pipeline_mode = #tpu.pipeline_mode<synchronous>, transform_indices = @transform_2, window_bounds = array<i64: 32, 32>}, {transform_indices = @transform_3, window_bounds = array<i64: 1, 32, 32>}]} {
    %c0 = arith.constant 0 : index
    %c0_0 = arith.constant 0 : index
    %c0_1 = arith.constant 0 : index
    %0 = vector.load %arg2[%c0, %c0_0, %c0_1] : memref<1x32x128xbf16, #tpu.memory_space<vmem>>, vector<1x32x128xbf16>
    %1 = vector.shape_cast %0 : vector<1x32x128xbf16> to vector<32x128xbf16>
    %c0_2 = arith.constant 0 : index
    %c0_3 = arith.constant 0 : index
    %2 = vector.load %arg3[%c0_2, %c0_3] : memref<128x32xbf16, #tpu.memory_space<vmem>>, vector<128x32xbf16>
    %cst = arith.constant dense<0.000000e+00> : vector<32x32xf32>
    %3 = tpu.matmul %1, %2, %cst {dimension_numbers = #tpu.dot_dimension_numbers<[1], [0], [0], [1], [0, 0, 1, 1], [], []>} : vector<32x128xbf16>, vector<128x32xbf16>, vector<32x32xf32> -> vector<32x32xf32>
    %c0_4 = arith.constant 0 : index
    %c0_5 = arith.constant 0 : index
    %4 = vector.load %arg4[%c0_4, %c0_5] : memref<32x32xf32, #tpu.memory_space<vmem>>, vector<32x32xf32>
    %5 = arith.addf %3, %4 : vector<32x32xf32>
    %c0_6 = arith.constant 0 : index
    %c0_7 = arith.constant 0 : index
    %c0_8 = arith.constant 0 : index
    %6 = vector.load %arg5[%c0_6, %c0_7, %c0_8] : memref<1x32x32xf32, #tpu.memory_space<vmem>>, vector<1x32x32xf32>
    %7 = vector.shape_cast %6 : vector<1x32x32xf32> to vector<32x32xf32>
    %8 = vector.shape_cast %5 : vector<32x32xf32> to vector<1x32x32xf32>
    tpu.vector_store %arg5[%c0_6, %c0_7, %c0_8], %8 {strides = array<i32>} : memref<1x32x32xf32, #tpu.memory_space<vmem>>, vector<1x32x32xf32>,
    return
  }
  func.func @transform_0(%arg0: i32, %arg1: i32) -> (i32, i32, i32) {
    %c0_i32 = arith.constant 0 : i32
    %c0_i32_0 = arith.constant 0 : i32
    return %arg1, %arg0, %c0_i32 : i32, i32, i32
  }
  func.func @transform_1(%arg0: i32, %arg1: i32) -> (i32, i32) {
    %c0_i32 = arith.constant 0 : i32
    %c0_i32_0 = arith.constant 0 : i32
    %c0_i32_1 = arith.constant 0 : i32
    return %c0_i32, %c0_i32_0 : i32, i32
  }
  func.func @transform_2(%arg0: i32, %arg1: i32) -> (i32, i32) {
    %c0_i32 = arith.constant 0 : i32
    %c0_i32_0 = arith.constant 0 : i32
    return %arg0, %c0_i32 : i32, i32
  }
  func.func @transform_3(%arg0: i32, %arg1: i32) -> (i32, i32, i32) {
    %c0_i32 = arith.constant 0 : i32
    %c0_i32_0 = arith.constant 0 : i32
    return %arg1, %arg0, %c0_i32 : i32, i32, i32
  }
}

</mosaic_0001>

<bundles_post_ra>
// kernel: vivit_embeddings.1
= control target key start
LH: loop header
LB: loop body
LE: loop exit
PB: predicated region body
PF: predicated region fallthrough
CT: control target
= control target key end

     0   :  { %8 = vsyncpa [#allocation3], 0  ;;  %s852_s0 = inlined_call_operand.vmem [shape: bf16[2,32,128], index: 0, kind: input, shape index: {}]   ;;  %s853_s1 = inlined_call_operand.vmem [shape: bf16[128,32], index: 1, kind: input, shape index: {}]   ;;  %s854_s2 = inlined_call_operand.vmem [shape: f32[32,32], index: 2, kind: input, shape index: {}]   ;;  %s855_s3 = inlined_call_operand.hbm [shape: f32[2,32,32], index: 3, kind: output, shape index: {}]  }
   0x1   :  { %10 = vsyncpa [#allocation3 + $0x1], 0  ;;  %s697_s12 = smov 0   ;;  %s699_s13 = smov 0  }
   0x2   :  { %s701_s14 = smov 0   ;;  %s703_s15 = smov 0  }
   0x3   :  { %s705_s16 = smov 0   ;;  %s707_s17 = smov 0  }
   0x4 LB: > { %s471_s18 = sadd.s32 4294967295, %s672_s17   ;;  %s472_s19 = sadd.s32 4294967294, %s672_s17   ;;  %s672_s17 = sphi %s707_s17, %s16_s17   ;;  %s668_s16 = sphi %s705_s16, %s862_s16   ;;  %s664_s15 = sphi %s703_s15, %s861_s15   ;;  %s660_s14 = sphi %s701_s14, %s860_s14   ;;  %s656_s13 = sphi %s699_s13, %s859_s13   ;;  %s652_s12 = sphi %s697_s12, %s858_s12  }
   0x5   : > { %s25_s20 = sadd.s32 1, %s668_s16  ;;  %s112_s21 = sadd.s32 1, %s660_s14 }
   0x6   : > { %p26_p0 = scmp.ge.s32.totalorder %s25_s20, 2  ;;  %p122_p1 = scmp.ne.s32.totalorder %s660_s14, %s656_s13 }
   0x7   : > { %p123_p2 = scmp.eq.s32.totalorder %s471_s18, 1  ;;  %p128_p3 = scmp.ne.s32.totalorder %s656_s13, %s652_s12 }
   0x8   : > { %s864_s20 = smov (%p26_p0, %s25_s20), 0  ;;  %p129_p5 = scmp.eq.s32.totalorder %s472_s19, 1 }
   0x9   : > { %p737_p4 = por %p123_p2, %p122_p1  ;;  %s107_s23 = ssub.s32 %s668_s16, %s864_s20 }
   0xa   : > { %p476_p6 = scmp.ge.s32.totalorder %s672_s17, 1  ;;  %p110_p7 = scmp.eq.s32.totalorder %s107_s23, 0 }
   0xb   : > { %p744_p8 = por %p129_p5, %p128_p3  ;;  %p172_p9 = scmp.lt.s32.totalorder %s672_s17, 3 }
   0xc   : > { %s750_s25 = scalar_select %p110_p7, %s660_s14, %s112_s21  }
   0xd   : > { %p173_p10 = pnand %p476_p6, %p172_p9 }
   0xe   : > { %v584_v0 = vld [vmem:[%s853_s1] sm:$0xff] (!%p173_p10)   ;;  %p206_p11 = scmp.lt.s32.totalorder (!%p173_p10), %s664_s15, 1  ;;  %v585_v1 = vld [vmem:[%s853_s1 + $0x8] sm:$0xff] (!%p173_p10)   ;;  %v586_v2 = vld [vmem:[%s853_s1 + $0x10] sm:$0xff] (!%p173_p10)   ;;  %vm356_vm0 = vcmask (!%p173_p10), 261120  }
   0xf   : > { %176 = sbr.rel (%p173_p10) target bundleno = 279 (0x117), region = 32  ;;  %507 = vmatprep.subr.bf16.mxu0 (!%p173_p10), %v584_v0  ;;  %v587_v3 = vld [vmem:[%s853_s1 + $0x18] sm:$0xff] (!%p173_p10)   ;;  %v588_v5 = vld [vmem:[%s853_s1 + $0x20] sm:$0xff] (!%p173_p10)   ;;  %v589_v6 = vld [vmem:[%s853_s1 + $0x28] sm:$0xff] (!%p173_p10)  }
  0x10   : > { %508 = vmatpush3.bf16.msra.mxu0 (!%p173_p10), %v584_v0  ;;  %v590_v7 = vld [vmem:[%s853_s1 + $0x30] sm:$0xff] (!%p173_p10)   ;;  %v591_v8 = vld [vmem:[%s853_s1 + $0x38] sm:$0xff] (!%p173_p10)   ;;  %v243_v11 = vld [vmem:[%s854_s2] sm:$0xff] (!%p173_p10) }
  0x11   : > { %509 = vmatprep.subr.bf16.mxu0 (!%p173_p10), %v585_v1  ;;  %v245_v10 = vld [vmem:[%s854_s2 + $0x10] sm:$0xff] (!%p173_p10)  ;;  %v246_v13 = vld [vmem:[%s854_s2 + $0x18] sm:$0xff] (!%p173_p10)  ;;  %v244_v16 = vld [vmem:[%s854_s2 + $0x8] sm:$0xff] (!%p173_p10) }
  0x14   : > { %510 = vmatpush3.bf16.msra.mxu0 (!%p173_p10), %v585_v1 }
  0x15   : > { %511 = vmatprep.subr.bf16.mxu0 (!%p173_p10), %v586_v2 }
  0x16   : > { %s207_s30 = scalar_select %p206_p11, %s664_s15, 1 }
  0x18   : > { %s495_s6 = sshll.u32 %s207_s30, 4  ;;  %512 = vmatpush3.bf16.msra.mxu0 %v586_v2  ;;  %s202_s30 = sand.u32 1, %s656_s13  }
  0x19   : > { %s213_s9 = scalar_lea.vmem %s852_s0, %s495_s6  ;;  %513 = vmatprep.subr.bf16.mxu0 %v587_v3  ;;  %s477_s4 = sshll.u32 %s202_s30, 5 }
  0x1a   : > { %v592_v4 = vld [vmem:[%s213_s9] sm:$0xff]   ;;  %v593_v9 = vld [vmem:[%s213_s9 + $0x8] sm:$0xff]   ;;  %s204_s10 = scalar_lea.vmem [#allocation2], %s477_s4  ;;  %s496_s9 = sshll.u32 %s664_s15, 9 }
  0x1b   : > { %523 = vmatprep.mubr.bf16.mxu0 %v592_v4  ;;  %s377_s11 = sshll.u32 %s204_s10, 4  ;;  %s801_s27 = scalar_lea.hbm %s855_s3, %s496_s9  ;;  %s796_s11 = int_to_ptr.vmem [resolvable:$true] %s377_s11 }
  0x1c   : > { %514 = vmatpush3.bf16.msra.mxu0 %v587_v3  ;;  %s806_s28 = scalar_lea.sflag [#allocation3], %s202_s30  ;;  %s594_s29 = scalar_lea.vmem %s796_s11, 512 }
  0x1d   : > { %515 = vmatprep.subr.bf16.mxu0 %v588_v5  ;;  %p595_p12 = scmp.ne.s32.totalorder %s796_s11, %s594_s29  ;;  %s674_s4 = smov [#allocation2]  }
  0x1e   : > { %s598_s5 = sshll.u32 %s674_s4, 4  ;;  %s599_s5 = int_to_ptr.vmem [resolvable:$false] %s598_s5 }
  0x1f   : > { %p596_p13 = pnand %p595_p12, %p737_p4  ;;  %s600_s6 = scalar_lea.vmem %s599_s5, 1024 }
  0x20   : > { %516 = vmatpush3.bf16.msra.mxu0 %v588_v5  ;;  %p601_p1 = scmp.lt.s32.totalorder %s796_s11, %s599_s5  ;;  %p602_p2 = scmp.lt.s32.totalorder %s600_s6, %s594_s29 }
  0x21   : > { %517 = vmatprep.subr.bf16.mxu0 %v589_v6  ;;  %p597_p0 = pneg %p596_p13 }
  0x22   : > { %p603_p3 = por %p602_p2, %p601_p1 }
  0x24   : > { %518 = vmatpush3.bf16.msra.mxu0 %v589_v6  ;;  %p604_p5 = pnand %p603_p3, %p597_p0 }
  0x25   : > { %519 = vmatprep.subr.bf16.mxu0 %v590_v7 }
  0x28   : > { %520 = vmatpush3.bf16.msra.mxu0 %v590_v7 }
  0x29   : > { %521 = vmatprep.subr.bf16.mxu0 %v591_v8 }
  0x2c   : > { %522 = vmatpush3.bf16.msra.mxu0 %v591_v8 }
  0x2f   : > { %524 = vmatmul.mubr.bf16.vlgmr.msra.gmra.mrb[0].mxu0 %v593_v9 }
 0x102   : > { %v525_v12 = vpop.f32.mrb[0].mxu0 }
 0x103   : > { %v350_v14 = vadd.f32 %v525_v12, %v245_v10  ;;  %v341_v15 = vpop.f32.mrb[1].mxu0 }
 0x104   : > { %v342_v17 = vadd.f32 %v341_v15, %v243_v11  ;;  %v526_v18 = vpop.f32.mrb[2].mxu0 }
 0x105   : > { %359 = vst.msk [vmem:[%s204_s10 + $0x10] sm:$0xff] %vm356_vm0, %v350_v14  ;;  %v353_v19 = vadd.f32 %v526_v18, %v246_v13  ;;  %v344_v20 = vpop.f32.mrb[3].mxu0 }
 0x106   : > { %357 = vst.msk [vmem:[%s204_s10] sm:$0xff] %vm356_vm0, %v342_v17  ;;  %v345_v21 = vadd.f32 %v344_v20, %v244_v16 }
 0x107   : > { %360 = vst.msk [vmem:[%s204_s10 + $0x18] sm:$0xff] %vm356_vm0, %v353_v19 }
 0x108   : > { %358 = vst.msk [vmem:[%s204_s10 + $0x8] sm:$0xff] %vm356_vm0, %v345_v21 }
 0x109   : > { %607 = shalt.err (!%p604_p5)
}
 0x10a   : > { %s608_s30 = scalar_lea.hbm %s801_s27, 512  ;;  %s612_s10 = scalar_lea.hbm %s855_s3, 1024 }
 0x10b   : > { %p609_p6 = scmp.ne.s32.totalorder %s801_s27, %s608_s30  ;;  %p613_p10 = scmp.lt.u32.totalorder %s801_s27, %s855_s3 }
 0x10c   : > { %p614_p11 = scmp.lt.u32.totalorder %s612_s10, %s608_s30  ;;  %p616_p13 = scmp.lt.u32.totalorder %s608_s30, %s801_s27 }
 0x10d   : > { %p610_p7 = pnand %p609_p6, %p737_p4 }
 0x10e   : > { %p615_p12 = por %p614_p11, %p613_p10 }
 0x10f   : > { %p611_p9 = pneg %p610_p7 }
 0x110   : > { %p617_p0 = por %p616_p13, %p615_p12 }
 0x112   : > { %p618_p1 = pnand %p617_p0, %p611_p9 }
 0x114   : > { %621 = shalt.err (!%p618_p1)
}
 0x115   : > { %s675_s9 = smov 128   ;;  %s676_s21 = smov 8  }
 0x116   : > { %527 = dma.vmem_to_hbm [thread:$0]  (%p737_p4), %s796_s11, 512, %s801_s27, %s806_s28, %s675_s9, %s675_s9, %s676_s21  }
 0x117 PF: > { %p533_p2 = scmp.ge.s32.totalorder %s672_s17, 2  ;;  %s392_s23 = sand.u32 1, %s652_s12  }
 0x118   : > { %s393_s26 = scalar_lea.sflag [#allocation3], %s392_s23 }
 0x119   : > { %p530_p3 = pnand %p533_p2, %p744_p8 }
 0x11b   : > { %647 = dma.done.wait (!%p530_p3), %s393_s26, 512  }
 0x11c   : > { %649 = vsyncadd (!%p530_p3), %s393_s26, 4294966784  ;;  %s16_s17 = sadd.s32 1, %s672_s17   ;;  %s858_s12 = smov %s656_s13 }
 0x11d   : > { %p13_p5 = scmp.ge.s32.totalorder %s16_s17, 4   ;;  %s859_s13 = smov %s660_s14 }
 0x11e   : > { %s860_s14 = smov %s750_s25  ;;  %s861_s15 = smov %s668_s16 }
 0x11f   : > { %s862_s16 = smov %s864_s20  ;;  %15 = sbr.rel (!%p13_p5) target bundleno = 4 (0x4), region = 70 }
 0x126   :  { %398 = vsyncpa [#allocation3], 1 }
 0x127   :  { %400 = vsyncpa [#allocation3 + $0x1], 1 }

</bundles_post_ra>
